<compile_context>
chip_gen: v7x
topology: tpu7x:2x2x1
jax: 0.10.0
libtpu: 0.0.40
codegen_flags: <defaults>
</compile_context>

<pallas_src>
import jax
import jax.numpy as jnp
from jax.experimental import pallas as pl
from jax.experimental.pallas import tpu as pltpu

IN_DIM = 28 * 28          # 784
HIDDEN = 200
HIDDEN_PAD = 256          # lane/MXU aligned hidden width
NUM_CLASSES = 10
OUT_PAD = 128             # lane-dense width for the in-kernel log_softmax reduction
NEG_INF = -1e30           # padded-logit bias so softmax ignores padded columns
TB_MAX = 1024             # max batch-tile rows (mem-bound: big tiles amortize step overhead)


def _round_up(n: int, m: int) -> int:
    return ((n + m - 1) // m) * m


def mlp_kernel(x_ref, w1_ref, b1_ref, w2_ref, b2_ref, w3_ref, b3_ref, o_ref):
    """One batch tile: fc1+relu, fc2+relu, fc3, log_softmax, narrow store."""
    x = x_ref[...]                                            # (TB, 784) bf16

    # fc1 + ReLU : [TB,784]bf16 @ [784,256]bf16 -> f32, +b1 (f32)
    h1 = jnp.dot(x, w1_ref[...], preferred_element_type=jnp.float32) + b1_ref[...]
    h1 = jnp.maximum(h1, 0.0).astype(jnp.bfloat16)

    # fc2 + ReLU : [TB,256] @ [256,256]
    h2 = jnp.dot(h1, w2_ref[...], preferred_element_type=jnp.float32) + b2_ref[...]
    h2 = jnp.maximum(h2, 0.0).astype(jnp.bfloat16)

    # fc3 : [TB,256] @ [256,128]; padded columns get bias -1e30 -> exp() == 0
    logits = jnp.dot(h2, w3_ref[...], preferred_element_type=jnp.float32) + b3_ref[...]

    # numerically stable log_softmax over the lane-dense 128-wide logits (in VMEM)
    m = jnp.max(logits, axis=-1, keepdims=True)
    shifted = logits - m
    lse = jnp.log(jnp.sum(jnp.exp(shifted), axis=-1, keepdims=True))
    logp = shifted - lse                                       # (TB, 128) f32

    # store only the 10 real classes: tiny output stream, no post-kernel column slice
    o_ref[...] = logp[:, :NUM_CLASSES].astype(o_ref.dtype)


def _choose_batch_tile(B: int) -> int:
    """Big tiles (amortize ~0.35us/step), but keep >=2 tiles so v7x megacore is fed."""
    B8 = _round_up(max(B, 1), 8)
    tb = min(TB_MAX, _round_up(pl.cdiv(B8, 2), 8))
    return max(tb, 8)


def net_forward(x, padded_params):
    """x: [B, 784] (bf16 preferred; f32 is cast once). padded_params from prepare_params."""
    w1, b1, w2, b2, w3, b3 = padded_params
    B = x.shape[0]

    if x.dtype != jnp.bfloat16:
        # Ideally the caller streams bf16; cast once here if not.
        x = x.astype(jnp.bfloat16)

    TB = _choose_batch_tile(B)
    B_pad = _round_up(B, TB)
    if B_pad != B:
        x = jnp.pad(x, ((0, B_pad - B), (0, 0)))
    grid = (B_pad // TB,)

    weight_bytes = sum(int(p.size) * p.dtype.itemsize for p in padded_params)
    flops = 2 * B_pad * (IN_DIM * HIDDEN_PAD + HIDDEN_PAD * HIDDEN_PAD + HIDDEN_PAD * OUT_PAD)
    bytes_accessed = (
        B_pad * IN_DIM * 2          # bf16 input stream
        + weight_bytes              # resident params (read once)
        + B_pad * NUM_CLASSES * 4   # narrow f32 output
    )
    cost = pl.CostEstimate(
        flops=flops,
        transcendentals=B_pad * (OUT_PAD + 1),
        bytes_accessed=bytes_accessed,
    )

    # Explicit scoped-VMEM budget so TB up to 1024 never hits the 16/32 MiB defaults.
    est_vmem = (
        2 * TB * IN_DIM * 2             # double-buffered bf16 x tiles
        + 2 * TB * NUM_CLASSES * 4      # double-buffered f32 out tiles
        + 2 * weight_bytes              # resident params (default double-buffered)
        + 6 * TB * HIDDEN_PAD * 4       # f32/bf16 intermediates (h1, h2, logits, temps)
        + (8 << 20)                     # headroom for compiler scratch
    )
    vmem_limit = int(min(64 << 20, max(32 << 20, est_vmem)))

    def resident(shape):
        # full-array block, constant index map -> loaded once, stays in VMEM
        return pl.BlockSpec(shape, lambda i: (0, 0))

    out = pl.pallas_call(
        mlp_kernel,
        out_shape=jax.ShapeDtypeStruct((B_pad, NUM_CLASSES), jnp.float32),
        grid=grid,
        in_specs=[
            pl.BlockSpec((TB, IN_DIM), lambda i: (i, 0)),   # x tiles stream over batch (bf16)
            resident((IN_DIM, HIDDEN_PAD)),                 # W1
            resident((1, HIDDEN_PAD)),                      # b1
            resident((HIDDEN_PAD, HIDDEN_PAD)),             # W2
            resident((1, HIDDEN_PAD)),                      # b2
            resident((HIDDEN_PAD, OUT_PAD)),                # W3
            resident((1, OUT_PAD)),                         # b3
        ],
        out_specs=pl.BlockSpec((TB, NUM_CLASSES), lambda i: (i, 0)),
        compiler_params=pltpu.CompilerParams(
            dimension_semantics=("parallel",),              # shard batch tiles across TCs
            vmem_limit_bytes=vmem_limit,
        ),
        cost_estimate=cost,
    )(x, w1, b1, w2, b2, w3, b3)

    # only a cheap row-slice remains, and only when the batch was padded
    if B_pad != B:
        out = out[:B]
    return out


def init_params(key):
    """PyTorch-style Linear init (784->200->200->10), stored as [in, out], f32."""
    k1, k2, k3 = jax.random.split(key, 3)

    def linear_init(k, fan_in, fan_out):
        bound = 1.0 / jnp.sqrt(jnp.float32(fan_in))
        kw, kb = jax.random.split(k)
        w = jax.random.uniform(kw, (fan_in, fan_out), jnp.float32, -bound, bound)
        b = jax.random.uniform(kb, (1, fan_out), jnp.float32, -bound, bound)
        return w, b

    w1, b1 = linear_init(k1, IN_DIM, HIDDEN)
    w2, b2 = linear_init(k2, HIDDEN, HIDDEN)
    w3, b3 = linear_init(k3, HIDDEN, NUM_CLASSES)
    return (w1, b1, w2, b2, w3, b3)


def prepare_params(params):
    """Pad to lane-dense widths and cast weights to bf16 (biases stay f32)."""
    w1, b1, w2, b2, w3, b3 = params

    w1p = jnp.zeros((IN_DIM, HIDDEN_PAD), jnp.bfloat16).at[:, :HIDDEN].set(w1.astype(jnp.bfloat16))
    b1p = jnp.zeros((1, HIDDEN_PAD), jnp.float32).at[:, :HIDDEN].set(b1)

    w2p = jnp.zeros((HIDDEN_PAD, HIDDEN_PAD), jnp.bfloat16).at[:HIDDEN, :HIDDEN].set(w2.astype(jnp.bfloat16))
    b2p = jnp.zeros((1, HIDDEN_PAD), jnp.float32).at[:, :HIDDEN].set(b2)

    w3p = jnp.zeros((HIDDEN_PAD, OUT_PAD), jnp.bfloat16).at[:HIDDEN, :NUM_CLASSES].set(w3.astype(jnp.bfloat16))
    # padded logit columns get a huge negative bias so log_softmax ignores them
    b3p = jnp.full((1, OUT_PAD), NEG_INF, jnp.float32).at[:, :NUM_CLASSES].set(b3)

    return (w1p, b1p, w2p, b2p, w3p, b3p)


def net_reference(x, padded_params):
    """Pure-JAX reference using the same padded bf16 weights (for a tolerance check)."""
    w1, b1, w2, b2, w3, b3 = padded_params
    xb = x.astype(jnp.bfloat16)
    h1 = jnp.maximum(jnp.dot(xb, w1, preferred_element_type=jnp.float32) + b1, 0.0).astype(jnp.bfloat16)
    h2 = jnp.maximum(jnp.dot(h1, w2, preferred_element_type=jnp.float32) + b2, 0.0).astype(jnp.bfloat16)
    logits = jnp.dot(h2, w3, preferred_element_type=jnp.float32) + b3
    return jax.nn.log_softmax(logits, axis=-1)[:, :NUM_CLASSES]


# TODO(synk): the SGD/NLLLoss training loop in the PyTorch source is outside the
# module forward pass and is not translated here.

if __name__ == "__main__":
    key = jax.random.PRNGKey(0)
    kp, kx = jax.random.split(key)

    params = init_params(kp)
    padded = prepare_params(params)

    def check(batch, kx):
        x = jax.random.normal(kx, (batch, IN_DIM), jnp.float32)
        x_bf16 = x.astype(jnp.bfloat16)          # stream bf16 into the kernel

        out = jax.block_until_ready(net_forward(x_bf16, padded))
        assert out.shape == (batch, NUM_CLASSES), out.shape

        # log_softmax rows must exp-sum to ~1 (padding columns must not leak in)
        row_sums = jnp.exp(out).sum(axis=-1)
        assert bool(jnp.all(jnp.abs(row_sums - 1.0) < 1e-3)), row_sums

        # match a pure-JAX reference built from the same padded bf16 params
        ref = net_reference(x_bf16, padded)
        assert bool(jnp.all(jnp.abs(out - ref) < 5e-2)), float(jnp.max(jnp.abs(out - ref)))

    kx1, kx2 = jax.random.split(kx)
    check(8, kx1)    # single-tile grid
    check(20, kx2)   # multi-tile grid + batch padding path

    print("KERNEL_OK")
</pallas_src>

<mosaic_0001>
module attributes {stable_mosaic.version = 11 : i64} {
  func.func @mlp_kernel(%arg0: i32, %arg1: memref<8x784xbf16, #tpu.memory_space<vmem>>, %arg2: memref<784x256xbf16, #tpu.memory_space<vmem>>, %arg3: memref<1x256xf32, #tpu.memory_space<vmem>>, %arg4: memref<256x256xbf16, #tpu.memory_space<vmem>>, %arg5: memref<1x256xf32, #tpu.memory_space<vmem>>, %arg6: memref<256x128xbf16, #tpu.memory_space<vmem>>, %arg7: memref<1x128xf32, #tpu.memory_space<vmem>>, %arg8: memref<8x10xf32, #tpu.memory_space<vmem>>) attributes {dimension_semantics = [#tpu.dimension_semantics<parallel>], iteration_bounds = array<i64: 1>, scalar_prefetch = 0 : i64, scratch_operands = 0 : i64, tpu.core_type = #tpu.core_type<tc>, window_params = [{transform_indices = @transform_0, window_bounds = array<i64: 8, 784>}, {pipeline_mode = #tpu.pipeline_mode<synchronous>, transform_indices = @transform_1, window_bounds = array<i64: 784, 256>}, {pipeline_mode = #tpu.pipeline_mode<synchronous>, transform_indices = @transform_2, window_bounds = array<i64: 1, 256>}, {pipeline_mode = #tpu.pipeline_mode<synchronous>, transform_indices = @transform_3, window_bounds = array<i64: 256, 256>}, {pipeline_mode = #tpu.pipeline_mode<synchronous>, transform_indices = @transform_4, window_bounds = array<i64: 1, 256>}, {pipeline_mode = #tpu.pipeline_mode<synchronous>, transform_indices = @transform_5, window_bounds = array<i64: 256, 128>}, {pipeline_mode = #tpu.pipeline_mode<synchronous>, transform_indices = @transform_6, window_bounds = array<i64: 1, 128>}, {transform_indices = @transform_7, window_bounds = array<i64: 8, 10>}]} {
    %c0 = arith.constant 0 : index
    %c0_0 = arith.constant 0 : index
    %0 = vector.load %arg1[%c0, %c0_0] : memref<8x784xbf16, #tpu.memory_space<vmem>>, vector<8x784xbf16>
    %c0_1 = arith.constant 0 : index
    %c0_2 = arith.constant 0 : index
    %1 = vector.load %arg2[%c0_1, %c0_2] : memref<784x256xbf16, #tpu.memory_space<vmem>>, vector<784x256xbf16>
    %cst = arith.constant dense<0.000000e+00> : vector<8x256xf32>
    %2 = tpu.matmul %0, %1, %cst {dimension_numbers = #tpu.dot_dimension_numbers<[1], [0], [0], [1], [0, 0, 1, 1], [], []>} : vector<8x784xbf16>, vector<784x256xbf16>, vector<8x256xf32> -> vector<8x256xf32>
    %c0_3 = arith.constant 0 : index
    %c0_4 = arith.constant 0 : index
    %3 = vector.load %arg3[%c0_3, %c0_4] : memref<1x256xf32, #tpu.memory_space<vmem>>, vector<1x256xf32>
    %4 = vector.broadcast %3 : vector<1x256xf32> to vector<8x256xf32>
    %5 = arith.addf %2, %4 : vector<8x256xf32>
    %cst_5 = arith.constant 0.000000e+00 : f32
    %6 = vector.broadcast %cst_5 : f32 to vector<8x256xf32>
    %7 = arith.maximumf %5, %6 : vector<8x256xf32>
    %8 = arith.truncf %7 : vector<8x256xf32> to vector<8x256xbf16>
    %c0_6 = arith.constant 0 : index
    %c0_7 = arith.constant 0 : index
    %9 = vector.load %arg4[%c0_6, %c0_7] : memref<256x256xbf16, #tpu.memory_space<vmem>>, vector<256x256xbf16>
    %cst_8 = arith.constant dense<0.000000e+00> : vector<8x256xf32>
    %10 = tpu.matmul %8, %9, %cst_8 {dimension_numbers = #tpu.dot_dimension_numbers<[1], [0], [0], [1], [0, 0, 1, 1], [], []>} : vector<8x256xbf16>, vector<256x256xbf16>, vector<8x256xf32> -> vector<8x256xf32>
    %c0_9 = arith.constant 0 : index
    %c0_10 = arith.constant 0 : index
    %11 = vector.load %arg5[%c0_9, %c0_10] : memref<1x256xf32, #tpu.memory_space<vmem>>, vector<1x256xf32>
    %12 = vector.broadcast %11 : vector<1x256xf32> to vector<8x256xf32>
    %13 = arith.addf %10, %12 : vector<8x256xf32>
    %cst_11 = arith.constant 0.000000e+00 : f32
    %14 = vector.broadcast %cst_11 : f32 to vector<8x256xf32>
    %15 = arith.maximumf %13, %14 : vector<8x256xf32>
    %16 = arith.truncf %15 : vector<8x256xf32> to vector<8x256xbf16>
    %c0_12 = arith.constant 0 : index
    %c0_13 = arith.constant 0 : index
    %17 = vector.load %arg6[%c0_12, %c0_13] : memref<256x128xbf16, #tpu.memory_space<vmem>>, vector<256x128xbf16>
    %cst_14 = arith.constant dense<0.000000e+00> : vector<8x128xf32>
    %18 = tpu.matmul %16, %17, %cst_14 {dimension_numbers = #tpu.dot_dimension_numbers<[1], [0], [0], [1], [0, 0, 1, 1], [], []>} : vector<8x256xbf16>, vector<256x128xbf16>, vector<8x128xf32> -> vector<8x128xf32>
    %c0_15 = arith.constant 0 : index
    %c0_16 = arith.constant 0 : index
    %19 = vector.load %arg7[%c0_15, %c0_16] : memref<1x128xf32, #tpu.memory_space<vmem>>, vector<1x128xf32>
    %20 = vector.broadcast %19 : vector<1x128xf32> to vector<8x128xf32>
    %21 = arith.addf %18, %20 : vector<8x128xf32>
    %cst_17 = arith.constant dense<0xFF800000> : vector<8xf32>
    %22 = vector.multi_reduction <maximumf>, %21, %cst_17 [1] : vector<8x128xf32> to vector<8xf32>
    %23 = vector.shape_cast %22 : vector<8xf32> to vector<8x1xf32>
    %24 = vector.broadcast %23 : vector<8x1xf32> to vector<8x128xf32>
    %25 = arith.subf %21, %24 : vector<8x128xf32>
    %26 = math.exp %25 : vector<8x128xf32>
    %cst_18 = arith.constant dense<0.000000e+00> : vector<8xf32>
    %27 = vector.multi_reduction <add>, %26, %cst_18 [1] : vector<8x128xf32> to vector<8xf32>
    %28 = vector.shape_cast %27 : vector<8xf32> to vector<8x1xf32>
    %29 = math.log %28 : vector<8x1xf32>
    %30 = vector.broadcast %29 : vector<8x1xf32> to vector<8x128xf32>
    %31 = arith.subf %25, %30 : vector<8x128xf32>
    %32 = vector.extract_strided_slice %31 {offsets = [0, 0], sizes = [8, 10], strides = [1, 1]} : vector<8x128xf32> to vector<8x10xf32>
    %c0_19 = arith.constant 0 : index
    %c0_20 = arith.constant 0 : index
    %33 = vector.load %arg8[%c0_19, %c0_20] : memref<8x10xf32, #tpu.memory_space<vmem>>, vector<8x10xf32>
    tpu.vector_store %arg8[%c0_19, %c0_20], %32 {strides = array<i32>} : memref<8x10xf32, #tpu.memory_space<vmem>>, vector<8x10xf32>,
    return
  }
  func.func @transform_0(%arg0: i32) -> (i32, i32) {
    %c0_i32 = arith.constant 0 : i32
    %c0_i32_0 = arith.constant 0 : i32
    return %arg0, %c0_i32 : i32, i32
  }
  func.func @transform_1(%arg0: i32) -> (i32, i32) {
    %c0_i32 = arith.constant 0 : i32
    %c0_i32_0 = arith.constant 0 : i32
    %c0_i32_1 = arith.constant 0 : i32
    return %c0_i32, %c0_i32_0 : i32, i32
  }
  func.func @transform_2(%arg0: i32) -> (i32, i32) {
    %c0_i32 = arith.constant 0 : i32
    %c0_i32_0 = arith.constant 0 : i32
    %c0_i32_1 = arith.constant 0 : i32
    return %c0_i32, %c0_i32_0 : i32, i32
  }
  func.func @transform_3(%arg0: i32) -> (i32, i32) {
    %c0_i32 = arith.constant 0 : i32
    %c0_i32_0 = arith.constant 0 : i32
    %c0_i32_1 = arith.constant 0 : i32
    return %c0_i32, %c0_i32_0 : i32, i32
  }
  func.func @transform_4(%arg0: i32) -> (i32, i32) {
    %c0_i32 = arith.constant 0 : i32
    %c0_i32_0 = arith.constant 0 : i32
    %c0_i32_1 = arith.constant 0 : i32
    return %c0_i32, %c0_i32_0 : i32, i32
  }
  func.func @transform_5(%arg0: i32) -> (i32, i32) {
    %c0_i32 = arith.constant 0 : i32
    %c0_i32_0 = arith.constant 0 : i32
    %c0_i32_1 = arith.constant 0 : i32
    return %c0_i32, %c0_i32_0 : i32, i32
  }
  func.func @transform_6(%arg0: i32) -> (i32, i32) {
    %c0_i32 = arith.constant 0 : i32
    %c0_i32_0 = arith.constant 0 : i32
    %c0_i32_1 = arith.constant 0 : i32
    return %c0_i32, %c0_i32_0 : i32, i32
  }
  func.func @transform_7(%arg0: i32) -> (i32, i32) {
    %c0_i32 = arith.constant 0 : i32
    %c0_i32_0 = arith.constant 0 : i32
    return %arg0, %c0_i32 : i32, i32
  }
}

</mosaic_0001>

<bundles_post_ra>
// kernel: tpu_custom_call.1
= control target key start
LH: loop header
LB: loop body
LE: loop exit
PB: predicated region body
PF: predicated region fallthrough
CT: control target
= control target key end

     0   :  { %12 = vsyncpa [#allocation3], 0  ;;  %s2010_s0 = inlined_call_operand.hbm [shape: bf16[8,784], index: 0, kind: input, shape index: {}]   ;;  %s2011_s1 = inlined_call_operand.hbm [shape: bf16[784,256], index: 1, kind: input, shape index: {}]   ;;  %s2012_s2 = inlined_call_operand.vmem [shape: f32[1,256], index: 2, kind: input, shape index: {}]   ;;  %s2013_s3 = inlined_call_operand.hbm [shape: bf16[256,256], index: 3, kind: input, shape index: {}]   ;;  %s2014_s4 = inlined_call_operand.vmem [shape: f32[1,256], index: 4, kind: input, shape index: {}]   ;;  %s2015_s5 = inlined_call_operand.hbm [shape: bf16[256,128], index: 5, kind: input, shape index: {}]   ;;  %s2016_s6 = inlined_call_operand.vmem [shape: f32[1,128], index: 6, kind: input, shape index: {}]   ;;  %s2017_s7 = inlined_call_operand.hbm [shape: f32[8,10], index: 7, kind: output, shape index: {}]  }
   0x1   :  { %13 = vsyncpa [#allocation6], 0 }
   0x2   :  { %14 = vsyncpa [#allocation9], 0 }
   0x3   :  { %15 = vsyncpa [#allocation4], 0  ;;  %s1873_s24 = smov [#allocation5]   ;;  %s1755_s28 = scalar_lea.hbm %s2011_s1, 12544 }
   0x4   :  { %s31_s25 = sshll.u32 %s1873_s24, 4  ;;  %p1756_p0 = scmp.ne.s32.totalorder %s2011_s1, %s1755_s28  ;;  %s32_s25 = int_to_ptr.vmem [resolvable:$true] %s31_s25 }
   0x5   :  { %p1759_p1 = scmp.lt.u32.totalorder %s1755_s28, %s2011_s1 }
   0x7   :  { %p1761_p2 = pnand %p1759_p1, %p1756_p0 }
   0x9   :  { %1764 = shalt.err (!%p1761_p2)
}
   0xa   :  { %s1765_s10 = scalar_lea.vmem %s32_s25, 12544  ;;  %p1770_p4 = scmp.lt.s32.totalorder %s32_s25, %s32_s25 }
   0xb   :  { %p1766_p3 = scmp.ne.s32.totalorder %s32_s25, %s1765_s10  ;;  %p1771_p5 = scmp.lt.s32.totalorder %s1765_s10, %s1765_s10 }
   0xd   :  { %p1772_p6 = por %p1771_p5, %p1770_p4 }
   0xf   :  { %p1773_p7 = pnand %p1772_p6, %p1766_p3 }
  0x11   :  { %1776 = shalt.err (!%p1773_p7)
}
  0x12   :  { %s1874_s11 = smov 128   ;;  %s1875_s12 = smov 8  }
  0x13   :  { %37 = dma.hbm_to_vmem [thread:$0]  %s2011_s1, 12544, %s32_s25, [#allocation6], %s1874_s11, %s1874_s11, %s1875_s12  }
  0x14   :  { %s1876_s15 = smov [#allocation2]   ;;  %s1877_s17 = smov [#allocation7]  }
  0x15   :  { %s22_s16 = sshll.u32 %s1876_s15, 4  ;;  %s45_s18 = sshll.u32 %s1877_s17, 4  ;;  %s23_s16 = int_to_ptr.vmem [resolvable:$true] %s22_s16  ;;  %s46_s18 = int_to_ptr.vmem [resolvable:$true] %s45_s18 }
  0x16   :  { %s1777_s21 = scalar_lea.hbm %s2010_s0, 448 }
  0x17   :  { %p1778_p8 = scmp.ne.s32.totalorder %s2010_s0, %s1777_s21  ;;  %p1781_p9 = scmp.lt.u32.totalorder %s1777_s21, %s2010_s0 }
  0x19   :  { %p1783_p10 = pnand %p1781_p9, %p1778_p8 }
  0x1b   :  { %1786 = shalt.err (!%p1783_p10)
}
  0x1c   :  { %s1787_s1 = scalar_lea.vmem %s23_s16, 448  ;;  %p1792_p12 = scmp.lt.s32.totalorder %s23_s16, %s23_s16 }
  0x1d   :  { %p1788_p11 = scmp.ne.s32.totalorder %s23_s16, %s1787_s1  ;;  %p1793_p13 = scmp.lt.s32.totalorder %s1787_s1, %s1787_s1 }
  0x1f   :  { %p1794_p0 = por %p1793_p13, %p1792_p12 }
  0x21   :  { %p1795_p1 = pnand %p1794_p0, %p1788_p11 }
  0x23   :  { %1798 = shalt.err (!%p1795_p1)
}
  0x24   :  { %25 = dma.hbm_to_vmem [thread:$0]  %s2010_s0, 448, %s23_s16, [#allocation3]  }
  0x25   :  { %s1799_s30 = scalar_lea.hbm %s2013_s3, 4096 }
  0x26   :  { %p1800_p2 = scmp.ne.s32.totalorder %s2013_s3, %s1799_s30  ;;  %p1803_p3 = scmp.lt.u32.totalorder %s1799_s30, %s2013_s3 }
  0x28   :  { %p1805_p4 = pnand %p1803_p3, %p1800_p2 }
  0x2a   :  { %1808 = shalt.err (!%p1805_p4)
}
  0x2b   :  { %s1809_s14 = scalar_lea.vmem %s46_s18, 4096  ;;  %p1814_p6 = scmp.lt.s32.totalorder %s46_s18, %s46_s18 }
  0x2c   :  { %p1810_p5 = scmp.ne.s32.totalorder %s46_s18, %s1809_s14  ;;  %p1815_p7 = scmp.lt.s32.totalorder %s1809_s14, %s1809_s14 }
  0x2e   :  { %p1816_p8 = por %p1815_p7, %p1814_p6 }
  0x30   :  { %p1817_p9 = pnand %p1816_p8, %p1810_p5 }
  0x32   :  { %1820 = shalt.err (!%p1817_p9)
}
  0x33   :  { %51 = dma.hbm_to_vmem [thread:$0]  %s2013_s3, 4096, %s46_s18, [#allocation6], %s1874_s11, %s1874_s11, %s1875_s12  }
  0x34   :  { %s1878_s16 = smov [#allocation8]   ;;  %s1821_s21 = scalar_lea.hbm %s2015_s5, 2048 }
  0x35   :  { %s59_s17 = sshll.u32 %s1878_s16, 4  ;;  %p1822_p10 = scmp.ne.s32.totalorder %s2015_s5, %s1821_s21  ;;  %s60_s17 = int_to_ptr.vmem [resolvable:$true] %s59_s17 }
  0x36   :  { %p1825_p11 = scmp.lt.u32.totalorder %s1821_s21, %s2015_s5 }
  0x38   :  { %p1827_p12 = pnand %p1825_p11, %p1822_p10 }
  0x3a   :  { %1830 = shalt.err (!%p1827_p12)
}
  0x3b   :  { %s1831_s1 = scalar_lea.vmem %s60_s17, 2048  ;;  %p1836_p0 = scmp.lt.s32.totalorder %s60_s17, %s60_s17 }
  0x3c   :  { %p1832_p13 = scmp.ne.s32.totalorder %s60_s17, %s1831_s1  ;;  %p1837_p1 = scmp.lt.s32.totalorder %s1831_s1, %s1831_s1 }
  0x3e   :  { %p1838_p2 = por %p1837_p1, %p1836_p0 }
  0x40   :  { %p1839_p3 = pnand %p1838_p2, %p1832_p13 }
  0x42   :  { %1842 = shalt.err (!%p1839_p3)
}
  0x43   :  { %s1879_s3 = smov 64   ;;  %s1880_s11 = smov 4  }
  0x44   :  { %65 = dma.hbm_to_vmem [thread:$0]  %s2015_s5, 2048, %s60_s17, [#allocation9], %s1879_s3, %s1879_s3, %s1880_s11  }
  0x45   :  { %1865 = dma.done.wait [#allocation3], 448  }
  0x46   :  { %1866 = vsyncadd [#allocation3], 4294966848 }
  0x47   :  { %1867 = dma.done.wait [#allocation6], 16640  }
  0x48   :  { %1868 = vsyncadd [#allocation6], 4294950656 }
  0x49   :  { %1869 = dma.done.wait [#allocation9], 2048  }
  0x4a   :  { %1870 = vsyncadd [#allocation9], 4294965248  ;;  %v1533_v0 = vld [vmem:[#allocation5 + $0x104] ss:$8 sps:$4 sm:$0xff]   ;;  %v1535_v1 = vld [vmem:[#allocation5 + $0x100] ss:$8 sps:$4 sm:$0xff]  }
  0x4b   :  { %754 = vmatprep.subr.bf16.mxu0 %v1533_v0  ;;  %v1536_v2 = vld [vmem:[#allocation5 + $0x114] ss:$8 sps:$4 sm:$0xff]   ;;  %v1538_v3 = vld [vmem:[#allocation5 + $0x110] ss:$8 sps:$4 sm:$0xff]   ;;  %v1539_v4 = vld [vmem:[#allocation5 + $0x124] ss:$8 sps:$4 sm:$0xff]  }
  0x4c   :  { %755 = vmatpush1.bf16.msra.mxu0 %v1535_v1  ;;  %v1541_v5 = vld [vmem:[#allocation5 + $0x120] ss:$8 sps:$4 sm:$0xff]   ;;  %v1542_v6 = vld [vmem:[#allocation5 + $0x134] ss:$8 sps:$4 sm:$0xff]   ;;  %v1544_v7 = vld [vmem:[#allocation5 + $0x130] ss:$8 sps:$4 sm:$0xff]  }
  0x4d   :  { %756 = vmatprep.subr.bf16.mxu0 %v1536_v2  ;;  %v1545_v8 = vld [vmem:[#allocation5 + $0x144] ss:$8 sps:$4 sm:$0xff]   ;;  %v1547_v9 = vld [vmem:[#allocation5 + $0x140] ss:$8 sps:$4 sm:$0xff]   ;;  %v1548_v10 = vld [vmem:[#allocation5 + $0x154] ss:$8 sps:$4 sm:$0xff]  }
  0x4e   :  { %v1550_v11 = vld [vmem:[#allocation5 + $0x150] ss:$8 sps:$4 sm:$0xff]   ;;  %v1551_v12 = vld [vmem:[#allocation5 + $0x164] ss:$8 sps:$4 sm:$0xff]   ;;  %v1553_v15 = vld [vmem:[#allocation5 + $0x160] ss:$8 sps:$4 sm:$0xff]  }
  0x4f   :  { %v1977_v13 = vld [vmem:[#allocation2 + $0x8] sm:$0xff]  ;;  %v1554_v16 = vld [vmem:[#allocation5 + $0x174] ss:$8 sps:$4 sm:$0xff]   ;;  %v1594_v19 = vld [vmem:[#allocation5] ss:$8 sps:$4 sm:$0xff]   ;;  %vm709_vm0 = vcmask 130048  }
  0x50   :  { %757 = vmatpush1.bf16.msra.mxu0 %v1538_v3  ;;  %v1337_v14 = vcombine.high %v1977_v13, %v1977_v13  ;;  %v1589_v17 = vld [vmem:[#allocation5 + $0x4] ss:$8 sps:$4 sm:$0xff]   ;;  %v1556_v18 = vld [vmem:[#allocation5 + $0x170] ss:$8 sps:$4 sm:$0xff]   ;;  %v1595_v20 = vld [vmem:[#allocation5 + $0x14] ss:$8 sps:$4 sm:$0xff]   ;;  %v1336_v57 = vcombine.low %v1977_v13, %v1977_v13 }
  0x51   :  { %758 = vmatprep.subr.bf16.mxu0 %v1539_v4  ;;  %713 = vmatprep.subr.bf16.mxu1 %v1589_v17  ;;  %v1557_v21 = vld [vmem:[#allocation5 + $0x184] ss:$8 sps:$4 sm:$0xff]   ;;  %v1600_v22 = vld [vmem:[#allocation5 + $0x10] ss:$8 sps:$4 sm:$0xff]   ;;  %v1559_v24 = vld [vmem:[#allocation5 + $0x180] ss:$8 sps:$4 sm:$0xff]  }
  0x52   :  { %786 = vmatprep.mubr.bf16.mxu0 %v1337_v14  ;;  %714 = vmatpush1.bf16.msra.mxu1 %v1594_v19  ;;  %v1601_v23 = vld [vmem:[#allocation5 + $0x24] ss:$8 sps:$4 sm:$0xff]   ;;  %v1560_v25 = vld [vmem:[#allocation5 + $0x194] ss:$8 sps:$4 sm:$0xff]   ;;  %v1606_v26 = vld [vmem:[#allocation5 + $0x20] ss:$8 sps:$4 sm:$0xff]  }
  0x53   :  { %715 = vmatprep.subr.bf16.mxu1 %v1595_v20  ;;  %v1607_v27 = vld [vmem:[#allocation5 + $0x34] ss:$8 sps:$4 sm:$0xff]   ;;  %v1562_v28 = vld [vmem:[#allocation5 + $0x190] ss:$8 sps:$4 sm:$0xff]   ;;  %v1563_v29 = vld [vmem:[#allocation5 + $0x1a4] ss:$8 sps:$4 sm:$0xff]  }
  0x54   :  { %759 = vmatpush1.bf16.msra.mxu0 %v1541_v5  ;;  %v1612_v30 = vld [vmem:[#allocation5 + $0x30] ss:$8 sps:$4 sm:$0xff]   ;;  %v1613_v31 = vld [vmem:[#allocation5 + $0x44] ss:$8 sps:$4 sm:$0xff]   ;;  %v1565_v32 = vld [vmem:[#allocation5 + $0x1a0] ss:$8 sps:$4 sm:$0xff]  }
  0x55   :  { %760 = vmatprep.subr.bf16.mxu0 %v1542_v6  ;;  %v1566_v33 = vld [vmem:[#allocation5 + $0x1b4] ss:$8 sps:$4 sm:$0xff]   ;;  %v1618_v34 = vld [vmem:[#allocation5 + $0x40] ss:$8 sps:$4 sm:$0xff]   ;;  %v1568_v36 = vld [vmem:[#allocation5 + $0x1b0] ss:$8 sps:$4 sm:$0xff]  }
  0x56   :  { %716 = vmatpush1.bf16.msra.mxu1 %v1600_v22  ;;  %v1619_v35 = vld [vmem:[#allocation5 + $0x54] ss:$8 sps:$4 sm:$0xff]   ;;  %v1569_v37 = vld [vmem:[#allocation5 + $0x1c4] ss:$8 sps:$4 sm:$0xff]   ;;  %v1624_v38 = vld [vmem:[#allocation5 + $0x50] ss:$8 sps:$4 sm:$0xff]  }
  0x57   :  { %717 = vmatprep.subr.bf16.mxu1 %v1601_v23  ;;  %v1625_v39 = vld [vmem:[#allocation5 + $0x64] ss:$8 sps:$4 sm:$0xff]   ;;  %v1571_v40 = vld [vmem:[#allocation5 + $0x1c0] ss:$8 sps:$4 sm:$0xff]   ;;  %v1572_v41 = vld [vmem:[#allocation5 + $0x1d4] ss:$8 sps:$4 sm:$0xff]  }
  0x58   :  { %761 = vmatpush1.bf16.msra.mxu0 %v1544_v7  ;;  %v1630_v42 = vld [vmem:[#allocation5 + $0x60] ss:$8 sps:$4 sm:$0xff]   ;;  %v1631_v43 = vld [vmem:[#allocation5 + $0x74] ss:$8 sps:$4 sm:$0xff]   ;;  %v1574_v44 = vld [vmem:[#allocation5 + $0x1d0] ss:$8 sps:$4 sm:$0xff]  }
  0x59   :  { %762 = vmatprep.subr.bf16.mxu0 %v1545_v8  ;;  %v1575_v45 = vld [vmem:[#allocation5 + $0x1e4] ss:$8 sps:$4 sm:$0xff]   ;;  %v1636_v46 = vld [vmem:[#allocation5 + $0x70] ss:$8 sps:$4 sm:$0xff]   ;;  %v1577_v48 = vld [vmem:[#allocation5 + $0x1e0] ss:$8 sps:$4 sm:$0xff]  }
  0x5a   :  { %718 = vmatpush1.bf16.msra.mxu1 %v1606_v26  ;;  %v1637_v47 = vld [vmem:[#allocation5 + $0x84] ss:$8 sps:$4 sm:$0xff]   ;;  %v1578_v49 = vld [vmem:[#allocation5 + $0x1f4] ss:$8 sps:$4 sm:$0xff]   ;;  %v1642_v50 = vld [vmem:[#allocation5 + $0x80] ss:$8 sps:$4 sm:$0xff]  }
  0x5b   :  { %719 = vmatprep.subr.bf16.mxu1 %v1607_v27  ;;  %v1643_v51 = vld [vmem:[#allocation5 + $0x94] ss:$8 sps:$4 sm:$0xff]   ;;  %v1580_v52 = vld [vmem:[#allocation5 + $0x1f0] ss:$8 sps:$4 sm:$0xff]   ;;  %v1585_v53 = vld [vmem:[#allocation5 + $0x204] ss:$8 sps:$4 sm:$0xff]  }
  0x5c   :  { %763 = vmatpush1.bf16.msra.mxu0 %v1547_v9  ;;  %v1648_v54 = vld [vmem:[#allocation5 + $0x90] ss:$8 sps:$4 sm:$0xff]   ;;  %v1649_v55 = vld [vmem:[#allocation5 + $0xa4] ss:$8 sps:$4 sm:$0xff]   ;;  %v1583_v58 = vld [vmem:[#allocation5 + $0x200] ss:$8 sps:$4 sm:$0xff]  }
  0x5d   :  { %764 = vmatprep.subr.bf16.mxu0 %v1548_v10  ;;  %v1981_v56 = vld [vmem:[#allocation2 + $0x10] sm:$0xff]  ;;  %v1654_v61 = vld [vmem:[#allocation5 + $0xa0] ss:$8 sps:$4 sm:$0xff]   ;;  %v1593_v1 = vld [vmem:[#allocation5 + $0x224] ss:$8 sps:$4 sm:$0xff]   ;;  %vm1315_vm1 = vcmask 80896  }
  0x5e   :  { %720 = vmatpush1.bf16.msra.mxu1 %v1612_v30  ;;  %v1339_v59 = vcombine.high %v1981_v56, %v1981_v56  ;;  %v1588_v60 = vld [vmem:[#allocation5 + $0x214] ss:$8 sps:$4 sm:$0xff]   ;;  %v1586_v63 = vld [vmem:[#allocation5 + $0x210] ss:$8 sps:$4 sm:$0xff]   ;;  %v81_v0 = vld [vmem:[#allocation2] sm:$0xff] }
  0x5f   :  { %721 = vmatprep.subr.bf16.mxu1 %v1613_v31  ;;  %v1655_v62 = vld [vmem:[#allocation5 + $0xb4] ss:$8 sps:$4 sm:$0xff]   ;;  %v1335_v2 = vcombine.high %v81_v0, %v81_v0  ;;  %v1660_v3 = vld [vmem:[#allocation5 + $0xb0] ss:$8 sps:$4 sm:$0xff]   ;;  %v1661_v4 = vld [vmem:[#allocation5 + $0xc4] ss:$8 sps:$4 sm:$0xff]  }
  0x60   :  { %765 = vmatpush1.bf16.msra.mxu0 %v1550_v11  ;;  %v1591_v5 = vld [vmem:[#allocation5 + $0x220] ss:$8 sps:$4 sm:$0xff]   ;;  %v1599_v6 = vld [vmem:[#allocation5 + $0x234] ss:$8 sps:$4 sm:$0xff]   ;;  %v1597_v9 = vld [vmem:[#allocation5 + $0x230] ss:$8 sps:$4 sm:$0xff]  }
  0x61   :  { %766 = vmatprep.subr.bf16.mxu0 %v1551_v12  ;;  %745 = vmatprep.mubr.bf16.mxu1 %v1335_v2  ;;  %v1666_v7 = vld [vmem:[#allocation5 + $0xc0] ss:$8 sps:$4 sm:$0xff]   ;;  %v1667_v8 = vld [vmem:[#allocation5 + $0xd4] ss:$8 sps:$4 sm:$0xff]   ;;  %v1605_v10 = vld [vmem:[#allocation5 + $0x244] ss:$8 sps:$4 sm:$0xff]  }
  0x62   :  { %722 = vmatpush1.bf16.msra.mxu1 %v1618_v34  ;;  %v1672_v11 = vld [vmem:[#allocation5 + $0xd0] ss:$8 sps:$4 sm:$0xff]   ;;  %v1675_v12 = vld [vmem:[#allocation5 + $0xe4] ss:$8 sps:$4 sm:$0xff]   ;;  %v1603_v13 = vld [vmem:[#allocation5 + $0x240] ss:$8 sps:$4 sm:$0xff]  }
  0x63   :  { %723 = vmatprep.subr.bf16.mxu1 %v1619_v35  ;;  %v1611_v14 = vld [vmem:[#allocation5 + $0x254] ss:$8 sps:$4 sm:$0xff]   ;;  %v1609_v17 = vld [vmem:[#allocation5 + $0x250] ss:$8 sps:$4 sm:$0xff]   ;;  %v1629_v27 = vld [vmem:[#allocation5 + $0x284] ss:$8 sps:$4 sm:$0xff]  }
  0x64   :  { %767 = vmatpush1.bf16.msra.mxu0 %v1553_v15  ;;  %v1680_v15 = vld [vmem:[#allocation5 + $0xe0] ss:$8 sps:$4 sm:$0xff]   ;;  %v1683_v19 = vld [vmem:[#allocation5 + $0xf0] ss:$8 sps:$4 sm:$0xff]   ;;  %v1689_v20 = vld [vmem:[#allocation7 + $0x4] ss:$8 sps:$4 sm:$0xff]  }
  0x65   :  { %768 = vmatprep.subr.bf16.mxu0 %v1554_v16  ;;  %v1681_v16 = vld [vmem:[#allocation5 + $0xf4] ss:$8 sps:$4 sm:$0xff]   ;;  %v1687_v23 = vld [vmem:[#allocation7] ss:$8 sps:$4 sm:$0xff]   ;;  %v1627_v30 = vld [vmem:[#allocation5 + $0x280] ss:$8 sps:$4 sm:$0xff]  }
  0x66   :  { %724 = vmatpush1.bf16.msra.mxu1 %v1624_v38  ;;  %v1623_v22 = vld [vmem:[#allocation5 + $0x274] ss:$8 sps:$4 sm:$0xff]   ;;  %v1621_v26 = vld [vmem:[#allocation5 + $0x270] ss:$8 sps:$4 sm:$0xff]   ;;  %v1641_v35 = vld [vmem:[#allocation5 + $0x2a4] ss:$8 sps:$4 sm:$0xff]  }
  0x67   :  { %725 = vmatprep.subr.bf16.mxu1 %v1625_v39  ;;  %v1635_v31 = vld [vmem:[#allocation5 + $0x294] ss:$8 sps:$4 sm:$0xff]   ;;  %v1633_v34 = vld [vmem:[#allocation5 + $0x290] ss:$8 sps:$4 sm:$0xff]   ;;  %v1639_v38 = vld [vmem:[#allocation5 + $0x2a0] ss:$8 sps:$4 sm:$0xff]  }
  0x68   :  { %769 = vmatpush1.bf16.msra.mxu0 %v1556_v18  ;;  %v1617_v18 = vld [vmem:[#allocation5 + $0x264] ss:$8 sps:$4 sm:$0xff]   ;;  %v1647_v39 = vld [vmem:[#allocation5 + $0x2b4] ss:$8 sps:$4 sm:$0xff]  }
  0x69   :  { %770 = vmatprep.subr.bf16.mxu0 %v1557_v21  ;;  %v1615_v21 = vld [vmem:[#allocation5 + $0x260] ss:$8 sps:$4 sm:$0xff]   ;;  %v1722_v2 = vld [vmem:[#allocation7 + $0xb4] ss:$8 sps:$4 sm:$0xff]  }
  0x6a   :  { %726 = vmatpush1.bf16.msra.mxu1 %v1630_v42  ;;  %v1645_v42 = vld [vmem:[#allocation5 + $0x2b0] ss:$8 sps:$4 sm:$0xff]  }
  0x6b   :  { %727 = vmatprep.subr.bf16.mxu1 %v1631_v43  ;;  %v1653_v43 = vld [vmem:[#allocation5 + $0x2c4] ss:$8 sps:$4 sm:$0xff]  }
  0x6c   :  { %771 = vmatpush1.bf16.msra.mxu0 %v1559_v24  ;;  %v1334_v24 = vcombine.low %v81_v0, %v81_v0  ;;  %v1677_v0 = vld [vmem:[#allocation5 + $0x300] ss:$8 sps:$4 sm:$0xff]  }
  0x6d   :  { %772 = vmatprep.subr.bf16.mxu0 %v1560_v25  ;;  %v1692_v25 = vld [vmem:[#allocation7 + $0x14] ss:$8 sps:$4 sm:$0xff]  }
  0x6e   :  { %728 = vmatpush1.bf16.msra.mxu1 %v1636_v46  ;;  %v1651_v46 = vld [vmem:[#allocation5 + $0x2c0] ss:$8 sps:$4 sm:$0xff]  }
  0x6f   :  { %729 = vmatprep.subr.bf16.mxu1 %v1637_v47  ;;  %v1659_v47 = vld [vmem:[#allocation5 + $0x2d4] ss:$8 sps:$4 sm:$0xff]  }
  0x70   :  { %773 = vmatpush1.bf16.msra.mxu0 %v1562_v28  ;;  %v1690_v28 = vld [vmem:[#allocation7 + $0x10] ss:$8 sps:$4 sm:$0xff]  }
  0x71   :  { %774 = vmatprep.subr.bf16.mxu0 %v1563_v29  ;;  %v1695_v29 = vld [vmem:[#allocation7 + $0x24] ss:$8 sps:$4 sm:$0xff]  }
  0x72   :  { %730 = vmatpush1.bf16.msra.mxu1 %v1642_v50  ;;  %v1657_v50 = vld [vmem:[#allocation5 + $0x2d0] ss:$8 sps:$4 sm:$0xff]  }
  0x73   :  { %731 = vmatprep.subr.bf16.mxu1 %v1643_v51  ;;  %v1665_v51 = vld [vmem:[#allocation5 + $0x2e4] ss:$8 sps:$4 sm:$0xff]  }
  0x74   :  { %775 = vmatpush1.bf16.msra.mxu0 %v1565_v32  ;;  %v1693_v32 = vld [vmem:[#allocation7 + $0x20] ss:$8 sps:$4 sm:$0xff]  }
  0x75   :  { %776 = vmatprep.subr.bf16.mxu0 %v1566_v33  ;;  %v1698_v33 = vld [vmem:[#allocation7 + $0x34] ss:$8 sps:$4 sm:$0xff]  }
  0x76   :  { %732 = vmatpush1.bf16.msra.mxu1 %v1648_v54  ;;  %v1663_v54 = vld [vmem:[#allocation5 + $0x2e0] ss:$8 sps:$4 sm:$0xff]  }
  0x77   :  { %733 = vmatprep.subr.bf16.mxu1 %v1649_v55  ;;  %v1671_v55 = vld [vmem:[#allocation5 + $0x2f4] ss:$8 sps:$4 sm:$0xff]  }
  0x78   :  { %777 = vmatpush1.bf16.msra.mxu0 %v1568_v36  ;;  %v1696_v36 = vld [vmem:[#allocation7 + $0x30] ss:$8 sps:$4 sm:$0xff]  }
  0x79   :  { %778 = vmatprep.subr.bf16.mxu0 %v1569_v37  ;;  %v1701_v37 = vld [vmem:[#allocation7 + $0x44] ss:$8 sps:$4 sm:$0xff]  }
  0x7a   :  { %734 = vmatpush1.bf16.msra.mxu1 %v1654_v61  ;;  %v1714_v61 = vld [vmem:[#allocation7 + $0x90] ss:$8 sps:$4 sm:$0xff]  }
  0x7b   :  { %735 = vmatprep.subr.bf16.mxu1 %v1655_v62  ;;  %v1719_v62 = vld [vmem:[#allocation7 + $0xa4] ss:$8 sps:$4 sm:$0xff]  }
  0x7c   :  { %779 = vmatpush1.bf16.msra.mxu0 %v1571_v40  ;;  %v1699_v40 = vld [vmem:[#allocation7 + $0x40] ss:$8 sps:$4 sm:$0xff]  }
  0x7d   :  { %780 = vmatprep.subr.bf16.mxu0 %v1572_v41  ;;  %v1704_v41 = vld [vmem:[#allocation7 + $0x54] ss:$8 sps:$4 sm:$0xff]  }
  0x7e   :  { %736 = vmatpush1.bf16.msra.mxu1 %v1660_v3  ;;  %v1881_v3 = vmov 0  }
  0x7f   :  { %737 = vmatprep.subr.bf16.mxu1 %v1661_v4  ;;  %v1720_v4 = vld [vmem:[#allocation7 + $0xb0] ss:$8 sps:$4 sm:$0xff]  }
  0x80   :  { %781 = vmatpush1.bf16.msra.mxu0 %v1574_v44  ;;  %v1702_v44 = vld [vmem:[#allocation7 + $0x50] ss:$8 sps:$4 sm:$0xff]  }
  0x81   :  { %782 = vmatprep.subr.bf16.mxu0 %v1575_v45  ;;  %v1707_v45 = vld [vmem:[#allocation7 + $0x64] ss:$8 sps:$4 sm:$0xff]  }
  0x82   :  { %738 = vmatpush1.bf16.msra.mxu1 %v1666_v7  ;;  %v1686_v7 = vld [vmem:[#allocation2 + $0x18] ss:$0 sps:$4 sm:$0xff]  }
  0x83   :  { %739 = vmatprep.subr.bf16.mxu1 %v1667_v8  ;;  %v1728_v8 = vld [vmem:[#allocation7 + $0xd4] ss:$8 sps:$4 sm:$0xff]  }
  0x84   :  { %783 = vmatpush1.bf16.msra.mxu0 %v1577_v48  ;;  %v1705_v48 = vld [vmem:[#allocation7 + $0x60] ss:$8 sps:$4 sm:$0xff]  }
  0x85   :  { %784 = vmatprep.subr.bf16.mxu0 %v1578_v49  ;;  %v1710_v49 = vld [vmem:[#allocation7 + $0x74] ss:$8 sps:$4 sm:$0xff]  }
  0x86   :  { %740 = vmatpush1.bf16.msra.mxu1 %v1672_v11  ;;  %v1734_v11 = vld [vmem:[#allocation7 + $0xf4] ss:$8 sps:$4 sm:$0xff]  }
  0x87   :  { %741 = vmatprep.subr.bf16.mxu1 %v1675_v12  ;;  %v1732_v12 = vld [vmem:[#allocation7 + $0xf0] ss:$8 sps:$4 sm:$0xff]  }
  0x88   :  { %785 = vmatpush1.bf16.msra.mxu0 %v1580_v52  ;;  %v1708_v52 = vld [vmem:[#allocation7 + $0x70] ss:$8 sps:$4 sm:$0xff]  }
  0x89   :  { %795 = vmatprep.subr.bf16.mxu0 %v1585_v53  ;;  %v1713_v53 = vld [vmem:[#allocation7 + $0x84] ss:$8 sps:$4 sm:$0xff]  }
  0x8a   :  { %742 = vmatpush1.bf16.msra.mxu1 %v1680_v15 }
  0x8b   :  { %787 = vmatmul.mubr.bf16.vlgmr.msra.gmra.mrb[0].mxu0 %v1336_v57  ;;  %743 = vmatprep.subr.bf16.mxu1 %v1681_v16  ;;  %v1711_v57 = vld [vmem:[#allocation7 + $0x80] ss:$8 sps:$4 sm:$0xff]  }
  0x8c   :  { %796 = vmatpush1.bf16.msra.mxu0 %v1583_v58  ;;  %827 = vmatprep.mubr.bf16.mxu0 %v1339_v59  ;;  %v1716_v58 = vld [vmem:[#allocation7 + $0x94] ss:$8 sps:$4 sm:$0xff]   ;;  %v1669_v59 = vld [vmem:[#allocation5 + $0x2f0] ss:$8 sps:$4 sm:$0xff]  }
  0x8d   :  { %797 = vmatprep.subr.bf16.mxu0 %v1588_v60  ;;  %v1679_v60 = vld [vmem:[#allocation5 + $0x304] ss:$8 sps:$4 sm:$0xff]  }
  0x8e   :  { %744 = vmatpush1.bf16.msra.mxu1 %v1683_v19 }
  0x8f   :  { %1085 = vmatprep.subr.bf16.mxu1 %v1689_v20 }
  0x90   :  { %798 = vmatpush1.bf16.msra.mxu0 %v1586_v63  ;;  %v1338_v63 = vcombine.low %v1981_v56, %v1981_v56  ;;  %v1726_v56 = vld [vmem:[#allocation7 + $0xd0] ss:$8 sps:$4 sm:$0xff]  }
  0x91   :  { %799 = vmatprep.subr.bf16.mxu0 %v1593_v1  ;;  %746 = vmatmul.mubr.bf16.vlgmr.msra.gmra.mrb[0].mxu1 %v1334_v24  ;;  %v1717_v1 = vld [vmem:[#allocation7 + $0xa0] ss:$8 sps:$4 sm:$0xff]  }
  0x92   :  { %1086 = vmatpush1.bf16.msra.mxu1 %v1687_v23 }
  0x93   :  { %1087 = vmatprep.subr.bf16.mxu1 %v1692_v25 }
  0x94   :  { %800 = vmatpush1.bf16.msra.mxu0 %v1591_v5  ;;  %v1725_v5 = vld [vmem:[#allocation7 + $0xc4] ss:$8 sps:$4 sm:$0xff]  }
  0x95   :  { %801 = vmatprep.subr.bf16.mxu0 %v1599_v6  ;;  %v1723_v6 = vld [vmem:[#allocation7 + $0xc0] ss:$8 sps:$4 sm:$0xff]  }
  0x96   :  { %1088 = vmatpush1.bf16.msra.mxu1 %v1690_v28 }
  0x97   :  { %1089 = vmatprep.subr.bf16.mxu1 %v1695_v29 }
  0x98   :  { %802 = vmatpush1.bf16.msra.mxu0 %v1597_v9  ;;  %v1731_v9 = vld [vmem:[#allocation7 + $0xe4] ss:$8 sps:$4 sm:$0xff]  }
  0x99   :  { %803 = vmatprep.subr.bf16.mxu0 %v1605_v10  ;;  %v1729_v10 = vld [vmem:[#allocation7 + $0xe0] ss:$8 sps:$4 sm:$0xff]  }
  0x9a   :  { %1090 = vmatpush1.bf16.msra.mxu1 %v1693_v32 }
  0x9b   :  { %1091 = vmatprep.subr.bf16.mxu1 %v1698_v33 }
  0x9c   :  { %804 = vmatpush1.bf16.msra.mxu0 %v1603_v13  ;;  %v1735_v13 = vld [vmem:[#allocation8 + $0x40] sm:$0xff]  }
  0x9d   :  { %805 = vmatprep.subr.bf16.mxu0 %v1611_v14 }
  0x9e   :  { %1092 = vmatpush1.bf16.msra.mxu1 %v1696_v36  ;;  %v1736_v36 = vld [vmem:[#allocation8] sm:$0xff]  }
  0x9f   :  { %1093 = vmatprep.subr.bf16.mxu1 %v1701_v37 }
  0xa0   :  { %806 = vmatpush1.bf16.msra.mxu0 %v1609_v17 }
  0xa1   :  { %807 = vmatprep.subr.bf16.mxu0 %v1617_v18  ;;  %v185_v18 = vlaneseq }
  0xa2   :  { %1094 = vmatpush1.bf16.msra.mxu1 %v1699_v40  ;;  %v1739_v40 = vld [vmem:[#allocation8 + $0x50] sm:$0xff]  }
  0xa3   :  { %1095 = vmatprep.subr.bf16.mxu1 %v1704_v41  ;;  %v186_v19 = vshrl.u32 %v185_v18, 7  ;;  %v1740_v41 = vld [vmem:[#allocation8 + $0x10] sm:$0xff]  }
  0xa4   :  { %808 = vmatpush1.bf16.msra.mxu0 %v1615_v21  ;;  %v183_v21 = vld [vmem:[%s2012_s2] sm:$0x3] }
  0xa5   :  { %809 = vmatprep.subr.bf16.mxu0 %v1623_v22  ;;  %v187_v20 = vsub.s32 0, %v186_v19  ;;  %v191_v22 = vsub.s32 1, %v186_v19 }
  0xa6   :  { %1096 = vmatpush1.bf16.msra.mxu1 %v1702_v44  ;;  %v1743_v44 = vld [vmem:[#allocation8 + $0x60] sm:$0xff]  }
  0xa7   :  { %1097 = vmatprep.subr.bf16.mxu1 %v1707_v45  ;;  %v188_v23 = vrot.slane %v183_v21, %v187_v20  ;;  %v192_v24 = vrot.slane %v183_v21, %v191_v22  ;;  %v1744_v45 = vld [vmem:[#allocation8 + $0x20] sm:$0xff]  }
  0xa8   :  { %810 = vmatpush1.bf16.msra.mxu0 %v1621_v26 }
  0xa9   :  { %811 = vmatprep.subr.bf16.mxu0 %v1629_v27 }
  0xaa   :  { %1098 = vmatpush1.bf16.msra.mxu1 %v1705_v48  ;;  %v1747_v48 = vld [vmem:[#allocation8 + $0x70] sm:$0xff]  }
  0xab   :  { %1099 = vmatprep.subr.bf16.mxu1 %v1710_v49  ;;  %v1748_v49 = vld [vmem:[#allocation8 + $0x30] sm:$0xff]  }
  0xac   :  { %812 = vmatpush1.bf16.msra.mxu0 %v1627_v30 }
  0xad   :  { %813 = vmatprep.subr.bf16.mxu0 %v1635_v31 }
  0xae   :  { %1100 = vmatpush1.bf16.msra.mxu1 %v1708_v52  ;;  %v913_v52 = vld [vmem:[%s2014_s4] sm:$0x3]  ;;  %s1882_s4 = smov [#allocation10]  }
  0xaf   :  { %1101 = vmatprep.subr.bf16.mxu1 %v1713_v53  ;;  %v918_v53 = vrot.slane %v913_v52, %v187_v20  ;;  %s1323_s30 = sshll.u32 %s1882_s4, 4  ;;  %s1324_s30 = int_to_ptr.vmem [resolvable:$true] %s1323_s30 }
  0xb0   :  { %814 = vmatpush1.bf16.msra.mxu0 %v1633_v34  ;;  %p1848_p5 = scmp.lt.s32.totalorder %s1324_s30, %s1324_s30 }
  0xb1   :  { %815 = vmatprep.subr.bf16.mxu0 %v1641_v35 }
  0xb2   :  { %1102 = vmatpush1.bf16.msra.mxu1 %v1711_v57 }
  0xb3   :  { %1103 = vmatprep.subr.bf16.mxu1 %v1716_v58 }
  0xb4   :  { %816 = vmatpush1.bf16.msra.mxu0 %v1639_v38  ;;  %v1737_v38 = vld [vmem:[#allocation8 + $0x48] sm:$0xff]  }
  0xb5   :  { %817 = vmatprep.subr.bf16.mxu0 %v1647_v39  ;;  %v1738_v39 = vld [vmem:[#allocation8 + $0x8] sm:$0xff]  }
  0xb6   :  { %1104 = vmatpush1.bf16.msra.mxu1 %v1714_v61 }
  0xb7   :  { %1105 = vmatprep.subr.bf16.mxu1 %v1719_v62 }
  0xb8   :  { %818 = vmatpush1.bf16.msra.mxu0 %v1645_v42  ;;  %v1741_v42 = vld [vmem:[#allocation8 + $0x58] sm:$0xff]  }
  0xb9   :  { %819 = vmatprep.subr.bf16.mxu0 %v1653_v43  ;;  %v1742_v43 = vld [vmem:[#allocation8 + $0x18] sm:$0xff]  }
  0xba   :  { %1106 = vmatpush1.bf16.msra.mxu1 %v1717_v1 }
  0xbb   :  { %1107 = vmatprep.subr.bf16.mxu1 %v1722_v2 }
  0xbc   :  { %820 = vmatpush1.bf16.msra.mxu0 %v1651_v46  ;;  %v1745_v46 = vld [vmem:[#allocation8 + $0x68] sm:$0xff]  }
  0xbd   :  { %821 = vmatprep.subr.bf16.mxu0 %v1659_v47  ;;  %v1746_v47 = vld [vmem:[#allocation8 + $0x28] sm:$0xff]  }
  0xbe   :  { %1108 = vmatpush1.bf16.msra.mxu1 %v1720_v4  ;;  %v1472_v4 = vld [vmem:[%s2016_s6] ss:$0 sm:$0xff]  ;;  %s1843_s6 = scalar_lea.vmem %s1324_s30, 128 }
  0xbf   :  { %1109 = vmatprep.subr.bf16.mxu1 %v1725_v5  ;;  %p1844_p4 = scmp.ne.s32.totalorder %s1324_s30, %s1843_s6  ;;  %p1849_p6 = scmp.lt.s32.totalorder %s1843_s6, %s1843_s6 }
  0xc0   :  { %822 = vmatpush1.bf16.msra.mxu0 %v1657_v50  ;;  %v1749_v50 = vld [vmem:[#allocation8 + $0x78] sm:$0xff]  }
  0xc1   :  { %823 = vmatprep.subr.bf16.mxu0 %v1665_v51  ;;  %v1750_v51 = vld [vmem:[#allocation8 + $0x38] sm:$0xff]   ;;  %p1850_p7 = por %p1849_p6, %p1848_p5 }
  0xc2   :  { %1110 = vmatpush1.bf16.msra.mxu1 %v1723_v6 }
  0xc3   :  { %1111 = vmatprep.subr.bf16.mxu1 %v1728_v8  ;;  %p1851_p8 = pnand %p1850_p7, %p1844_p4 }
  0xc4   :  { %824 = vmatpush1.bf16.msra.mxu0 %v1663_v54  ;;  %v922_v54 = vrot.slane %v913_v52, %v191_v22 }
  0xc5   :  { %825 = vmatprep.subr.bf16.mxu0 %v1671_v55 }
  0xc6   :  { %1112 = vmatpush1.bf16.msra.mxu1 %v1726_v56 }
  0xc7   :  { %1113 = vmatprep.subr.bf16.mxu1 %v1731_v9 }
  0xc8   :  { %826 = vmatpush1.bf16.msra.mxu0 %v1669_v59 }
  0xc9   :  { %836 = vmatprep.subr.bf16.mxu0 %v1679_v60 }
  0xca   :  { %1114 = vmatpush1.bf16.msra.mxu1 %v1729_v10 }
  0xcb   :  { %828 = vmatmul.mubr.bf16.vlgmr.msra.gmra.mrb[0].mxu0 %v1338_v63  ;;  %1115 = vmatprep.subr.bf16.mxu1 %v1734_v11 }
  0xcc   :  { %837 = vmatpush1.bf16.msra.mxu0 %v1677_v0  ;;  %868 = vmatprep.mubr.bf16.mxu0 %v1881_v3 }
  0xce   :  { %1116 = vmatpush1.bf16.msra.mxu1 %v1732_v12 }
  0xcf   :  { %1489 = vmatprep.subr.bf16.mxu1 %v1735_v13 }
  0xd7   :  { %1439 = vmatmul.mubr.msk.bf16.vlgmr.msra.gmra.mrb[0].mxu0 %vm709_vm0, %v1686_v7 }
 0x164   :  { %v747_v14 = vpop.f32.mrb[0].mxu1 }
 0x165   :  { %v749_v15 = vpop.f32.mrb[1].mxu1  ;;  %v748_v25 = vadd.f32 %v747_v14, %v188_v23 }
 0x166   :  { %v751_v16 = vpop.f32.mrb[2].mxu1  ;;  %v750_v26 = vadd.f32 %v749_v15, %v192_v24 }
 0x167   :  { %v752_v17 = vpop.f32.mrb[3].mxu1 }
 0x1aa   :  { %v870_v27 = vpop.f32.mrb[0].mxu0 }
 0x1ab   :  { %v1512_v28 = vadd.f32 %v870_v27, %v748_v25  ;;  %v872_v29 = vpop.f32.mrb[1].mxu0 }
 0x1ac   :  { %v1514_v30 = vadd.f32 %v872_v29, %v750_v26  ;;  %v874_v31 = vpop.f32.mrb[2].mxu0 }
 0x1ad   :  { %v877_v32 = vmax.f32 %v1512_v28, 0.0  ;;  %v875_v33 = vpop.f32.mrb[3].mxu0 }
 0x1ae   :  { %v878_v34 = vmax.f32 %v1514_v30, 0.0 }
 0x1af   :  { %v879_v37 = vpack.c.bf16 %v877_v32, %v877_v32 }
 0x1b0   :  { %v880_v35 = vpack.c.bf16 %v878_v34, %v878_v34 }
 0x1b2   :  { %1117 = vmatprep.mubr.bf16.mxu1 %v880_v35 }
 0x1b3   :  { %1118 = vmatmul.mubr.bf16.vlgmr.msra.gmra.mrb[4].mxu1 %v879_v37 }
 0x1b4   :  { %1490 = vmatpush3.bf16.msra.mxu1 %v1736_v36 }
 0x1b5   :  { %1491 = vmatprep.subr.bf16.mxu1 %v1737_v38 }
 0x1b8   :  { %1492 = vmatpush3.bf16.msra.mxu1 %v1738_v39 }
 0x1b9   :  { %1493 = vmatprep.subr.bf16.mxu1 %v1739_v40 }
 0x1bc   :  { %1494 = vmatpush3.bf16.msra.mxu1 %v1740_v41 }
 0x1bd   :  { %1495 = vmatprep.subr.bf16.mxu1 %v1741_v42 }
 0x1c0   :  { %1496 = vmatpush3.bf16.msra.mxu1 %v1742_v43 }
 0x1c1   :  { %1497 = vmatprep.subr.bf16.mxu1 %v1743_v44 }
 0x1c4   :  { %1498 = vmatpush3.bf16.msra.mxu1 %v1744_v45 }
 0x1c5   :  { %1499 = vmatprep.subr.bf16.mxu1 %v1745_v46 }
 0x1c8   :  { %1500 = vmatpush3.bf16.msra.mxu1 %v1746_v47 }
 0x1c9   :  { %1501 = vmatprep.subr.bf16.mxu1 %v1747_v48 }
 0x1cc   :  { %1502 = vmatpush3.bf16.msra.mxu1 %v1748_v49 }
 0x1cd   :  { %1503 = vmatprep.subr.bf16.mxu1 %v1749_v50 }
 0x1d0   :  { %1504 = vmatpush3.bf16.msra.mxu1 %v1750_v51 }
 0x286   :  { %v1119_v55 = vpop.f32.mrb[4].mxu1 }
 0x287   :  { %v1120_v57 = vadd.f32 %v1119_v55, %v918_v53  ;;  %v1121_v58 = vpop.f32.mrb[5].mxu1 }
 0x288   :  { %v1122_v59 = vadd.f32 %v1121_v58, %v922_v54  ;;  %v1123_v60 = vpop.f32.mrb[6].mxu1 }
 0x289   :  { %v1126_v61 = vmax.f32 %v1120_v57, 0.0  ;;  %v1124_v62 = vpop.f32.mrb[7].mxu1 }
 0x28a   :  { %v1127_v63 = vmax.f32 %v1122_v59, 0.0 }
 0x28b   :  { %v1128_v1 = vpack.c.bf16 %v1126_v61, %v1126_v61 }
 0x28c   :  { %v1129_v0 = vpack.c.bf16 %v1127_v63, %v1127_v63 }
 0x28e   :  { %1297 = vmatprep.mubr.bf16.mxu1 %v1129_v0 }
 0x28f   :  { %1298 = vmatmul.mubr.bf16.vlgmr.msra.gmra.mrb[8].mxu1 %v1128_v1 }
 0x362   :  { %v1505_v2 = vpop.f32.mrb[8].mxu1 }
 0x363   :  { %v1506_v3 = vpop.f32.mrb[9].mxu1 }
 0x364   :  { %v1507_v5 = vadd.f32 %v1506_v3, %v1505_v2  ;;  %v1508_v6 = vpop.f32.mrb[10].mxu1 }
 0x365   :  { %v1509_v7 = vpop.f32.mrb[11].mxu1 }
 0x366   :  { %v1300_v56 = vadd.f32 %v1507_v5, %v1472_v4 }
 0x368   :  { %1305 = vmax.xlane.f32.xlu0 %v1300_v56 }
 0x3f5   :  { %v1306_v8 = vpop.xlane.xlu0 %1305 }
 0x3f6   :  { %v1307_v9 = vsub.f32 %v1300_v56, %v1306_v8 }
 0x3f8   :  { %v1308_v10 = vmul.f32 1.442695, %v1307_v9 }
 0x3fa   :  { %1751 = vpow2.f32 %v1308_v10 }
 0x404   :  { %v1752_v11 = vpop.eup %1751 }
 0x405   :  { %1310 = vadd.xlane.f32.xlu0 %v1752_v11 }
 0x492   :  { %v1311_v12 = vpop.xlane.xlu0 %1310 }
 0x493   :  { %1753 = vlog2.f32 %v1311_v12 }
 0x49d   :  { %v1754_v13 = vpop.eup %1753 }
 0x49e   :  { %v1313_v14 = vmul.f32 0.6931472, %v1754_v13 }
 0x4a0   :  { %v1314_v15 = vsub.f32 %v1307_v9, %v1313_v14 }
 0x4a2   :  { %1316 = vst.msk [vmem:[#allocation10] sm:$0xff] %vm1315_vm1, %v1314_v15 }
 0x4a3   :  { %1854 = shalt.err (!%p1851_p8)
}
 0x4a4   :  { %s1855_s10 = scalar_lea.hbm %s2017_s7, 128 }
 0x4a5   :  { %p1856_p9 = scmp.ne.s32.totalorder %s2017_s7, %s1855_s10  ;;  %p1859_p10 = scmp.lt.u32.totalorder %s1855_s10, %s2017_s7 }
 0x4a7   :  { %p1861_p11 = pnand %p1859_p10, %p1856_p9 }
 0x4a9   :  { %1864 = shalt.err (!%p1861_p11)
}
 0x4aa   :  { %1326 = dma.vmem_to_hbm [thread:$0]  %s1324_s30, 128, %s2017_s7, [#allocation4]  }
 0x4ab   :  { %1871 = dma.done.wait [#allocation4], 128  }
 0x4ac   :  { %1872 = vsyncadd [#allocation4], 4294967168 }
 0x4ad   :  { %1330 = vsyncpa [#allocation3], 1 }
 0x4ae   :  { %1331 = vsyncpa [#allocation6], 1 }
 0x4af   :  { %1332 = vsyncpa [#allocation9], 1 }
 0x4b0   :  { %1333 = vsyncpa [#allocation4], 1 }

</bundles_post_ra>
